<compile_context>
chip_gen: v7x
topology: tpu7x:2x2x1
jax: 0.10.0
libtpu: 0.0.40
codegen_flags: <defaults>
</compile_context>

<pallas_src>
import jax
import jax.numpy as jnp
from jax.experimental import pallas as pl
from jax.experimental.pallas import tpu as pltpu

NEG_SLOPE = 0.01                 # torch.nn.LeakyReLU default
MXU_DTYPE = jnp.float32          # set to jnp.bfloat16 on v6e/v7x for peak MXU rate


# ----------------------------------------------------------------------------
# ConvTranspose1d(kernel_size=2, stride=2)
# ----------------------------------------------------------------------------
def _convt_k2s2_kernel(x_ref, w_ref, b_ref, o_ref):
    # x: (C_in, L);  w: (2*C_out, C_in) = [W[:,:,0].T ; W[:,:,1].T];  b: (2*C_out, 1)
    y = jnp.dot(w_ref[...].astype(MXU_DTYPE), x_ref[...].astype(MXU_DTYPE),
                preferred_element_type=jnp.float32)
    o_ref[...] = (y + b_ref[...]).astype(o_ref.dtype)


def convtranspose1d_k2s2(x, w, b):
    """PyTorch ConvTranspose1d(k=2, stride=2).  x:(N,C_in,L)  w:(C_in,C_out,2)."""
    N, C_in, L = x.shape
    C_out = w.shape[1]
    # Stack the two taps into ONE matmul: rows [0:C_out] -> even output
    # positions (tap 0), rows [C_out:2*C_out] -> odd positions (tap 1).
    w_stack = jnp.concatenate([w[:, :, 0].T, w[:, :, 1].T], axis=0)
    b_stack = jnp.concatenate([b, b]).reshape(2 * C_out, 1)
    y = pl.pallas_call(
        _convt_k2s2_kernel,
        out_shape=jax.ShapeDtypeStruct((N, 2 * C_out, L), x.dtype),
        grid_spec=pltpu.PrefetchScalarGridSpec(
            num_scalar_prefetch=0,
            grid=(N,),
            in_specs=[
                pl.BlockSpec((None, C_in, L), lambda n: (n, 0, 0)),
                pl.BlockSpec((2 * C_out, C_in), lambda n: (0, 0)),   # resident
                pl.BlockSpec((2 * C_out, 1), lambda n: (0, 0)),      # resident
            ],
            out_specs=pl.BlockSpec((None, 2 * C_out, L), lambda n: (n, 0, 0)),
        ),
        compiler_params=pltpu.CompilerParams(dimension_semantics=("parallel",)),
    )(x, w_stack, b_stack)
    # De-interleave phases (layout plumbing in the wrapper, not in the kernel):
    #   out[n, c, 2*l + p] = y[n, p*C_out + c, l]
    y = y.reshape(N, 2, C_out, L)
    return jnp.transpose(y, (0, 2, 3, 1)).reshape(N, C_out, 2 * L)


# ----------------------------------------------------------------------------
# deconv_block = LeakyReLU -> Conv1d(kernel_size=3, padding=1), fully fused
# ----------------------------------------------------------------------------
def _lrelu_conv_k3p1_kernel(x_ref, w_ref, b_ref, o_ref):
    # x: (C_in, L);  w: (C_out, 3*C_in) = [W[:,:,0] | W[:,:,1] | W[:,:,2]];  b: (C_out, 1)
    x = x_ref[...].astype(jnp.float32)
    a = jnp.where(x >= 0, x, NEG_SLOPE * x)                         # LeakyReLU
    L = a.shape[-1]
    lane = jax.lax.broadcasted_iota(jnp.int32, a.shape, 1)
    # Shifted neighbours via XLU roll + boundary mask (no lane-axis concat).
    a_m1 = jnp.where(lane == 0, 0.0, pltpu.roll(a, shift=1, axis=1))        # a[:, l-1]
    a_p1 = jnp.where(lane == L - 1, 0.0, pltpu.roll(a, shift=L - 1, axis=1))  # a[:, l+1]
    stacked = jnp.concatenate([a_m1, a, a_p1], axis=0)              # (3*C_in, L) sublane concat
    y = jnp.dot(w_ref[...].astype(MXU_DTYPE), stacked.astype(MXU_DTYPE),
                preferred_element_type=jnp.float32)
    o_ref[...] = (y + b_ref[...]).astype(o_ref.dtype)


def lrelu_conv1d_k3p1(x, w, b):
    """LeakyReLU followed by Conv1d(k=3, padding=1).  x:(N,C_in,L)  w:(C_out,C_in,3)."""
    N, C_in, L = x.shape
    C_out = w.shape[0]
    # Columns ordered [k=0 block | k=1 block | k=2 block] to match the row
    # order of the stacked activations [a(l-1); a(l); a(l+1)].
    w_big = jnp.transpose(w, (0, 2, 1)).reshape(C_out, 3 * C_in)
    return pl.pallas_call(
        _lrelu_conv_k3p1_kernel,
        out_shape=jax.ShapeDtypeStruct((N, C_out, L), x.dtype),
        grid_spec=pltpu.PrefetchScalarGridSpec(
            num_scalar_prefetch=0,
            grid=(N,),
            in_specs=[
                pl.BlockSpec((None, C_in, L), lambda n: (n, 0, 0)),
                pl.BlockSpec((C_out, 3 * C_in), lambda n: (0, 0)),   # resident
                pl.BlockSpec((C_out, 1), lambda n: (0, 0)),          # resident
            ],
            out_specs=pl.BlockSpec((None, C_out, L), lambda n: (n, 0, 0)),
        ),
        compiler_params=pltpu.CompilerParams(dimension_semantics=("parallel",)),
    )(x, w_big, b.reshape(C_out, 1))


# ----------------------------------------------------------------------------
# AdaptiveMaxPool1d + softmax(dim=-1), fused
# ----------------------------------------------------------------------------
def _pool_softmax_kernel(x_ref, mask_ref, o_ref):
    # x: (C, W_in);  mask: (W_out, W_in) additive window mask (0 in-window, -1e30 outside)
    x = x_ref[...].astype(jnp.float32)
    m = mask_ref[...]
    pooled = jnp.max(x[:, None, :] + m[None, :, :], axis=-1)        # (C, W_out) adaptive max pool
    z = pooled - jnp.max(pooled, axis=-1, keepdims=True)            # softmax over last dim
    e = jnp.exp(z)
    o_ref[...] = (e / jnp.sum(e, axis=-1, keepdims=True)).astype(o_ref.dtype)


def adaptive_maxpool1d_softmax(x, out_w):
    """AdaptiveMaxPool1d(output_size=out_w) followed by softmax over the last dim."""
    N, C, W_in = x.shape
    i = jnp.arange(out_w)
    starts = (i * W_in) // out_w
    ends = ((i + 1) * W_in + out_w - 1) // out_w                    # PyTorch adaptive windows
    j = jnp.arange(W_in)
    in_win = (j[None, :] >= starts[:, None]) & (j[None, :] < ends[:, None])
    mask = jnp.where(in_win, 0.0, -1e30).astype(jnp.float32)
    return pl.pallas_call(
        _pool_softmax_kernel,
        out_shape=jax.ShapeDtypeStruct((N, C, out_w), x.dtype),
        grid_spec=pltpu.PrefetchScalarGridSpec(
            num_scalar_prefetch=0,
            grid=(N,),
            in_specs=[
                pl.BlockSpec((None, C, W_in), lambda n: (n, 0, 0)),
                pl.BlockSpec((out_w, W_in), lambda n: (0, 0)),       # resident
            ],
            out_specs=pl.BlockSpec((None, C, out_w), lambda n: (n, 0, 0)),
        ),
        compiler_params=pltpu.CompilerParams(dimension_semantics=("parallel",)),
    )(x, mask)


# ----------------------------------------------------------------------------
# Model assembly (mirrors UpVgg11_1d.features layer-for-layer)
# ----------------------------------------------------------------------------
def upvgg11_1d_arch(in_channels, num_classes, width=512):
    """Layer list mirroring UpVgg11_1d.  width=512 reproduces the PyTorch
    module's hard-coded channel counts exactly; smaller `width` scales the
    schedule uniformly (for fast smoke tests)."""
    s = lambda c: max(1, (c * width) // 512)
    return [
        ("convt", in_channels, s(512)),
        ("block", s(512), s(512)),
        ("block", s(512), s(512)),
        ("convt", s(512), s(512)),
        ("block", s(512), s(512)),
        ("block", s(512), s(256)),
        ("convt", s(256), s(256)),
        ("block", s(256), s(256)),
        ("block", s(256), s(128)),
        ("convt", s(128), s(128)),
        ("block", s(128), s(64)),
        ("convt", s(64), s(64)),
        ("block", s(64), s(32)),
        ("convt", s(32), num_classes),
    ]


def init_params(key, arch):
    params = []
    for kind, c_in, c_out in arch:
        key, kw, kb = jax.random.split(key, 3)
        k = 2 if kind == "convt" else 3
        shape = (c_in, c_out, k) if kind == "convt" else (c_out, c_in, k)
        w = jax.random.normal(kw, shape, jnp.float32) * (c_in * k) ** -0.5
        b = 0.05 * jax.random.normal(kb, (c_out,), jnp.float32)
        params.append((w, b))
    return params


def upvgg11_1d_forward_pallas(x, arch, params, roi_size):
    for (kind, _, _), (w, b) in zip(arch, params):
        if kind == "convt":
            x = convtranspose1d_k2s2(x, w, b)
        else:
            x = lrelu_conv1d_k3p1(x, w, b)
    return adaptive_maxpool1d_softmax(x, roi_size)


# ----------------------------------------------------------------------------
# Pure-JAX reference (lax convs), mirrors the PyTorch forward
# ----------------------------------------------------------------------------
def upvgg11_1d_forward_reference(x, arch, params, roi_size):
    hi = jax.lax.Precision.HIGHEST
    for (kind, _, _), (w, b) in zip(arch, params):
        if kind == "convt":
            # ConvTranspose1d(k=2, s=2) == lhs-dilated conv with the flipped,
            # in/out-swapped kernel and (K-1) padding.
            w_f = jnp.flip(jnp.transpose(w, (1, 0, 2)), axis=-1)
            x = jax.lax.conv_general_dilated(
                x, w_f, window_strides=(1,), padding=[(1, 1)], lhs_dilation=(2,),
                dimension_numbers=("NCH", "OIH", "NCH"), precision=hi)
            x = x + b[None, :, None]
        else:
            x = jax.nn.leaky_relu(x, NEG_SLOPE)
            x = jax.lax.conv_general_dilated(
                x, w, window_strides=(1,), padding=[(1, 1)],
                dimension_numbers=("NCH", "OIH", "NCH"), precision=hi)
            x = x + b[None, :, None]
    w_in = x.shape[-1]
    starts = [(i * w_in) // roi_size for i in range(roi_size)]
    ends = [((i + 1) * w_in + roi_size - 1) // roi_size for i in range(roi_size)]
    pooled = jnp.stack(
        [jnp.max(x[..., s:e], axis=-1) for s, e in zip(starts, ends)], axis=-1)
    return jax.nn.softmax(pooled, axis=-1)


if __name__ == "__main__":
    # Small smoke-test shapes.  The real module uses width=512 / in_channels=512;
    # we scale the channel schedule 8x down (width=64) to keep the test fast
    # while preserving every layer / op of the architecture.
    N, L0 = 2, 4
    WIDTH = 64
    IN_CHANNELS = 64
    NUM_CLASSES = 1
    IN_ROI = ((3, 15),)                                  # roi size = 15 + 1 - 3 = 13
    roi_size = IN_ROI[0][1] + 1 - IN_ROI[0][0]

    arch = upvgg11_1d_arch(IN_CHANNELS, NUM_CLASSES, width=WIDTH)
    key = jax.random.PRNGKey(0)
    key, kx = jax.random.split(key)
    x = jax.random.normal(kx, (N, IN_CHANNELS, L0), jnp.float32)
    params = init_params(key, arch)

    out = upvgg11_1d_forward_pallas(x, arch, params, roi_size)
    out = jax.block_until_ready(out)

    ref = upvgg11_1d_forward_reference(x, arch, params, roi_size)
    assert out.shape == (N, NUM_CLASSES, roi_size), out.shape
    assert jnp.allclose(out, ref, atol=5e-3, rtol=5e-3), float(
        jnp.max(jnp.abs(out - ref)))

    print("KERNEL_OK")
</pallas_src>

<mosaic_0001>
module attributes {stable_mosaic.version = 11 : i64} {
  func.func @_convt_k2s2_kernel(%arg0: i32, %arg1: memref<1x64x4xf32, #tpu.memory_space<vmem>>, %arg2: memref<128x64xf32, #tpu.memory_space<vmem>>, %arg3: memref<128x1xf32, #tpu.memory_space<vmem>>, %arg4: memref<1x128x4xf32, #tpu.memory_space<vmem>>) attributes {dimension_semantics = [#tpu.dimension_semantics<parallel>], iteration_bounds = array<i64: 2>, scalar_prefetch = 0 : i64, scratch_operands = 0 : i64, tpu.core_type = #tpu.core_type<tc>, window_params = [{transform_indices = @transform_0, window_bounds = array<i64: 1, 64, 4>}, {pipeline_mode = #tpu.pipeline_mode<synchronous>, transform_indices = @transform_1, window_bounds = array<i64: 128, 64>}, {pipeline_mode = #tpu.pipeline_mode<synchronous>, transform_indices = @transform_2, window_bounds = array<i64: 128, 1>}, {transform_indices = @transform_3, window_bounds = array<i64: 1, 128, 4>}]} {
    %c0 = arith.constant 0 : index
    %c0_0 = arith.constant 0 : index
    %0 = vector.load %arg2[%c0, %c0_0] : memref<128x64xf32, #tpu.memory_space<vmem>>, vector<128x64xf32>
    %c0_1 = arith.constant 0 : index
    %c0_2 = arith.constant 0 : index
    %c0_3 = arith.constant 0 : index
    %1 = vector.load %arg1[%c0_1, %c0_2, %c0_3] : memref<1x64x4xf32, #tpu.memory_space<vmem>>, vector<1x64x4xf32>
    %2 = vector.shape_cast %1 : vector<1x64x4xf32> to vector<64x4xf32>
    %cst = arith.constant dense<0.000000e+00> : vector<128x4xf32>
    %3 = tpu.matmul %0, %2, %cst {dimension_numbers = #tpu.dot_dimension_numbers<[1], [0], [0], [1], [0, 0, 1, 1], [], []>} : vector<128x64xf32>, vector<64x4xf32>, vector<128x4xf32> -> vector<128x4xf32>
    %c0_4 = arith.constant 0 : index
    %c0_5 = arith.constant 0 : index
    %4 = vector.load %arg3[%c0_4, %c0_5] : memref<128x1xf32, #tpu.memory_space<vmem>>, vector<128x1xf32>
    %5 = vector.broadcast %4 : vector<128x1xf32> to vector<128x4xf32>
    %6 = arith.addf %3, %5 : vector<128x4xf32>
    %c0_6 = arith.constant 0 : index
    %c0_7 = arith.constant 0 : index
    %c0_8 = arith.constant 0 : index
    %7 = vector.load %arg4[%c0_6, %c0_7, %c0_8] : memref<1x128x4xf32, #tpu.memory_space<vmem>>, vector<1x128x4xf32>
    %8 = vector.shape_cast %7 : vector<1x128x4xf32> to vector<128x4xf32>
    %9 = vector.shape_cast %6 : vector<128x4xf32> to vector<1x128x4xf32>
    tpu.vector_store %arg4[%c0_6, %c0_7, %c0_8], %9 {strides = array<i32>} : memref<1x128x4xf32, #tpu.memory_space<vmem>>, vector<1x128x4xf32>,
    return
  }
  func.func @transform_0(%arg0: i32) -> (i32, i32, i32) {
    %c0_i32 = arith.constant 0 : i32
    %c0_i32_0 = arith.constant 0 : i32
    %c0_i32_1 = arith.constant 0 : i32
    return %arg0, %c0_i32, %c0_i32_0 : i32, i32, i32
  }
  func.func @transform_1(%arg0: i32) -> (i32, i32) {
    %c0_i32 = arith.constant 0 : i32
    %c0_i32_0 = arith.constant 0 : i32
    %c0_i32_1 = arith.constant 0 : i32
    return %c0_i32, %c0_i32_0 : i32, i32
  }
  func.func @transform_2(%arg0: i32) -> (i32, i32) {
    %c0_i32 = arith.constant 0 : i32
    %c0_i32_0 = arith.constant 0 : i32
    %c0_i32_1 = arith.constant 0 : i32
    return %c0_i32, %c0_i32_0 : i32, i32
  }
  func.func @transform_3(%arg0: i32) -> (i32, i32, i32) {
    %c0_i32 = arith.constant 0 : i32
    %c0_i32_0 = arith.constant 0 : i32
    %c0_i32_1 = arith.constant 0 : i32
    return %arg0, %c0_i32, %c0_i32_0 : i32, i32, i32
  }
}

</mosaic_0001>

<bundles_post_ra>
// kernel: tpu_custom_call.1
= control target key start
LH: loop header
LB: loop body
LE: loop exit
PB: predicated region body
PF: predicated region fallthrough
CT: control target
= control target key end

     0   :  { %s714_s12 = smov 0   ;;  %s881_s0 = inlined_call_operand.vmem [shape: f32[2,64,4], index: 0, kind: input, shape index: {}]   ;;  %s882_s1 = inlined_call_operand.vmem [shape: f32[128,64], index: 1, kind: input, shape index: {}]   ;;  %s883_s2 = inlined_call_operand.vmem [shape: f32[128,1], index: 2, kind: input, shape index: {}]   ;;  %s884_s3 = inlined_call_operand.vmem [shape: f32[2,128,4], index: 3, kind: output, shape index: {}]  }
   0x1 LB: > { %s557_s13 = sadd.s32 4294967295, %s691_s12   ;;  %p561_p0 = scmp.ge.s32.totalorder %s691_s12, 1  ;;  %s691_s12 = sphi %s714_s12, %s13_s12  }
   0x2   : > { %p137_p1 = scmp.lt.s32.totalorder %s691_s12, 3 }
   0x4   : > { %p138_p2 = pnand %p561_p0, %p137_p1 }
   0x5   : > { %p161_p3 = scmp.lt.s32.totalorder (!%p138_p2), %s557_s13, 1  ;;  %v171_v0 = vld [vmem:[%s882_s1] sm:$0xff] (!%p138_p2)  ;;  %vm291_vm0 = vcmask (!%p138_p2), 523264   ;;  %v693_v2 = vmov (!%p138_p2), 0   ;;  %v197_v3 = vld [vmem:[%s883_s2 + $0x10] sm:$0xff] (!%p138_p2)  ;;  %v198_v13 = vld [vmem:[%s883_s2 + $0x18] sm:$0xff] (!%p138_p2) }
   0x6   : > { %141 = sbr.rel (%p138_p2) target bundleno = 263 (0x107), region = 32  ;;  %v179_v1 = vld [vmem:[%s882_s1 + $0x40] sm:$0xff] (!%p138_p2)  ;;  %626 = vmatprep.mubr.msk.f32.mxu0 (!%p138_p2), %vm291_vm0, %v171_v0  ;;  %684 = vset.pattern.permute.xlu1 (!%p138_p2), %v693_v2  ;;  %v196_v14 = vld [vmem:[%s883_s2 + $0x8] sm:$0xff] (!%p138_p2)  ;;  %v202_v21 = vld [vmem:[%s883_s2 + $0x38] sm:$0xff] (!%p138_p2)  ;;  %vm485_vm1 = vcmask (!%p138_p2), 31744  }
   0x7   : > { %638 = vmatprep.mubr.msk.f32.mxu1 (!%p138_p2), %vm291_vm0, %v179_v1  ;;  %683 = vset.pattern.permute.xlu0 (!%p138_p2), %v693_v2  ;;  %v195_v4 = vld [vmem:[%s883_s2] sm:$0xff] (!%p138_p2)  ;;  %v200_v18 = vld [vmem:[%s883_s2 + $0x28] sm:$0xff] (!%p138_p2)  ;;  %v201_v22 = vld [vmem:[%s883_s2 + $0x30] sm:$0xff] (!%p138_p2) }
   0x8   : > { %223 = vperm.xlu1 (!%p138_p2), %684, %v197_v3   ;;  %213 = vperm.xlu0 (!%p138_p2), %683, %v195_v4   ;;  %v199_v19 = vld [vmem:[%s883_s2 + $0x20] sm:$0xff] (!%p138_p2)  ;;  %v204_v23 = vld [vmem:[%s883_s2 + $0x48] sm:$0xff] (!%p138_p2)  ;;  %v173_v27 = vld [vmem:[%s882_s1 + $0x10] sm:$0xff] (!%p138_p2) }
   0x9   : > { %v203_v24 = vld [vmem:[%s883_s2 + $0x40] sm:$0xff] (!%p138_p2)  ;;  %v172_v25 = vld [vmem:[%s882_s1 + $0x8] sm:$0xff] (!%p138_p2)  ;;  %v181_v28 = vld [vmem:[%s882_s1 + $0x50] sm:$0xff] (!%p138_p2) }
   0xa   : > { %v180_v26 = vld [vmem:[%s882_s1 + $0x48] sm:$0xff] (!%p138_p2)  ;;  %v206_v29 = vld [vmem:[%s883_s2 + $0x58] sm:$0xff] (!%p138_p2)  ;;  %v205_v30 = vld [vmem:[%s883_s2 + $0x50] sm:$0xff] (!%p138_p2) }
   0xb   : > { %v174_v31 = vld [vmem:[%s882_s1 + $0x18] sm:$0xff] (!%p138_p2)  ;;  %v175_v33 = vld [vmem:[%s882_s1 + $0x20] sm:$0xff] (!%p138_p2)  ;;  %v208_v35 = vld [vmem:[%s883_s2 + $0x68] sm:$0xff] (!%p138_p2) }
   0xc   : > { %228 = vperm.xlu1 (!%p138_p2), %684, %v198_v13   ;;  %218 = vperm.xlu0 (!%p138_p2), %683, %v196_v14   ;;  %v182_v32 = vld [vmem:[%s882_s1 + $0x58] sm:$0xff] (!%p138_p2)  ;;  %v183_v34 = vld [vmem:[%s882_s1 + $0x60] sm:$0xff] (!%p138_p2)  ;;  %v176_v37 = vld [vmem:[%s882_s1 + $0x28] sm:$0xff] (!%p138_p2) }
   0xd   : > { %s886_s13 = smov (!%p161_p3, %s557_s13), 1  ;;  %v207_v36 = vld [vmem:[%s883_s2 + $0x60] sm:$0xff]  ;;  %v184_v38 = vld [vmem:[%s882_s1 + $0x68] sm:$0xff]  ;;  %v177_v39 = vld [vmem:[%s882_s1 + $0x30] sm:$0xff] }
   0xe   : > { %s584_s18 = sshll.u32 %s886_s13, 6  ;;  %v185_v40 = vld [vmem:[%s882_s1 + $0x70] sm:$0xff]  ;;  %v210_v41 = vld [vmem:[%s883_s2 + $0x78] sm:$0xff]  ;;  %s585_s5 = sshll.u32 %s886_s13, 7 }
   0xf   : > { %s165_s21 = scalar_lea.vmem %s881_s0, %s584_s18  ;;  %v209_v42 = vld [vmem:[%s883_s2 + $0x70] sm:$0xff]  ;;  %v178_v43 = vld [vmem:[%s882_s1 + $0x38] sm:$0xff]  ;;  %s844_s8 = scalar_lea.vmem %s884_s3, %s585_s5 }
  0x10   : > { %v187_v5 = vld [vmem:[%s165_s21] sm:$0xff]  ;;  %v188_v6 = vld [vmem:[%s165_s21 + $0x8] sm:$0xff]  ;;  %v189_v7 = vld [vmem:[%s165_s21 + $0x10] sm:$0xff]  ;;  %238 = vperm.xlu1 %684, %v200_v18   ;;  %233 = vperm.xlu0 %683, %v199_v19  }
  0x11   : > { %v650_v8 = vpack.c.bf16 %v188_v6, %v187_v5  ;;  %v190_v9 = vld [vmem:[%s165_s21 + $0x18] sm:$0xff]  ;;  %v191_v11 = vld [vmem:[%s165_s21 + $0x20] sm:$0xff]  ;;  %v192_v12 = vld [vmem:[%s165_s21 + $0x28] sm:$0xff] }
  0x12   : > { %v654_v10 = vpack.c.bf16 %v190_v9, %v189_v7  ;;  %v658_v15 = vpack.c.bf16 %v192_v12, %v191_v11  ;;  %v193_v16 = vld [vmem:[%s165_s21 + $0x30] sm:$0xff]  ;;  %v194_v17 = vld [vmem:[%s165_s21 + $0x38] sm:$0xff] }
  0x13   : > { %651 = vmatprep.subr.bf16.mxu0 %v650_v8  ;;  %666 = vmatprep.subr.bf16.mxu1 %v650_v8  ;;  %v662_v20 = vpack.c.bf16 %v194_v17, %v193_v16  ;;  %v186_v44 = vld [vmem:[%s882_s1 + $0x78] sm:$0xff] }
  0x14   : > { %653 = vmatpush3.bf16.msra.mxu0 %v650_v8  ;;  %670 = vmatpush3.bf16.msra.mxu1 %v650_v8 }
  0x15   : > { %655 = vmatprep.subr.bf16.mxu0 %v654_v10  ;;  %667 = vmatprep.subr.bf16.mxu1 %v654_v10 }
  0x16   : > { %248 = vperm.xlu1 %684, %v202_v21   ;;  %243 = vperm.xlu0 %683, %v201_v22  }
  0x18   : > { %657 = vmatpush3.bf16.msra.mxu0 %v654_v10  ;;  %671 = vmatpush3.bf16.msra.mxu1 %v654_v10 }
  0x19   : > { %659 = vmatprep.subr.bf16.mxu0 %v658_v15  ;;  %668 = vmatprep.subr.bf16.mxu1 %v658_v15 }
  0x1a   : > { %258 = vperm.xlu1 %684, %v204_v23   ;;  %253 = vperm.xlu0 %683, %v203_v24  }
  0x1c   : > { %661 = vmatpush3.bf16.msra.mxu0 %v658_v15  ;;  %672 = vmatpush3.bf16.msra.mxu1 %v658_v15 }
  0x1d   : > { %663 = vmatprep.subr.bf16.mxu0 %v662_v20  ;;  %669 = vmatprep.subr.bf16.mxu1 %v662_v20 }
  0x1e   : > { %268 = vperm.xlu1 %684, %v206_v29   ;;  %263 = vperm.xlu0 %683, %v205_v30  }
  0x20   : > { %665 = vmatpush3.bf16.msra.mxu0 %v662_v20  ;;  %673 = vmatpush3.bf16.msra.mxu1 %v662_v20 }
  0x22   : > { %278 = vperm.xlu1 %684, %v208_v35   ;;  %273 = vperm.xlu0 %683, %v207_v36  }
  0x23   : > { %627 = vmatmul.mubr.msk.f32.vlgmr.msra.gmra.mrb[0].mxu0 %vm291_vm0, %v172_v25  ;;  %639 = vmatmul.mubr.msk.f32.vlgmr.msra.gmra.mrb[0].mxu1 %vm291_vm0, %v180_v26 }
  0x24   : > { %629 = vmatprep.mubr.msk.f32.mxu0 %vm291_vm0, %v173_v27  ;;  %641 = vmatprep.mubr.msk.f32.mxu1 %vm291_vm0, %v181_v28 }
  0x26   : > { %288 = vperm.xlu1 %684, %v210_v41   ;;  %283 = vperm.xlu0 %683, %v209_v42  }
  0x27   : > { %630 = vmatmul.mubr.msk.f32.gmra.mrb[2].mxu0 %vm291_vm0, %v174_v31  ;;  %642 = vmatmul.mubr.msk.f32.gmra.mrb[2].mxu1 %vm291_vm0, %v182_v32 }
  0x28   : > { %632 = vmatprep.mubr.msk.f32.mxu0 %vm291_vm0, %v175_v33  ;;  %644 = vmatprep.mubr.msk.f32.mxu1 %vm291_vm0, %v183_v34 }
  0x2b   : > { %633 = vmatmul.mubr.msk.f32.gmra.mrb[4].mxu0 %vm291_vm0, %v176_v37  ;;  %645 = vmatmul.mubr.msk.f32.gmra.mrb[4].mxu1 %vm291_vm0, %v184_v38 }
  0x2c   : > { %635 = vmatprep.mubr.msk.f32.mxu0 %vm291_vm0, %v177_v39  ;;  %647 = vmatprep.mubr.msk.f32.mxu1 %vm291_vm0, %v185_v40 }
  0x2f   : > { %636 = vmatmul.mubr.msk.f32.gmra.mrb[6].mxu0 %vm291_vm0, %v178_v43  ;;  %648 = vmatmul.mubr.msk.f32.gmra.mrb[6].mxu1 %vm291_vm0, %v186_v44 }
  0x87   : > { %v224_v45 = vpop.permute.xlu1 %223  ;;  %v214_v46 = vpop.permute.xlu0 %213 }
  0x8b   : > { %v229_v47 = vpop.permute.xlu1 %228  ;;  %v219_v48 = vpop.permute.xlu0 %218 }
  0x8f   : > { %v239_v49 = vpop.permute.xlu1 %238  ;;  %v234_v50 = vpop.permute.xlu0 %233 }
  0x95   : > { %v249_v51 = vpop.permute.xlu1 %248  ;;  %v244_v52 = vpop.permute.xlu0 %243 }
  0x99   : > { %v259_v53 = vpop.permute.xlu1 %258  ;;  %v254_v54 = vpop.permute.xlu0 %253 }
  0x9d   : > { %v269_v55 = vpop.permute.xlu1 %268  ;;  %v264_v56 = vpop.permute.xlu0 %263 }
  0xa1   : > { %v279_v1 = vpop.permute.xlu1 %278  ;;  %v274_v2 = vpop.permute.xlu0 %273 }
  0xa5   : > { %v289_v19 = vpop.permute.xlu1 %288  ;;  %v284_v20 = vpop.permute.xlu0 %283 }
  0xf6   : > { %v628_v57 = vpop.f32.mrb[0].mxu0  ;;  %v640_v58 = vpop.f32.mrb[0].mxu1 }
  0xf7   : > { %v412_v59 = vadd.f32 %v628_v57, %v219_v48  ;;  %v452_v60 = vadd.f32 %v640_v58, %v259_v53  ;;  %v406_v61 = vpop.f32.mrb[1].mxu0  ;;  %v446_v62 = vpop.f32.mrb[1].mxu1 }
  0xf8   : > { %v407_v63 = vadd.f32 %v406_v61, %v214_v46  ;;  %v447_v0 = vadd.f32 %v446_v62, %v254_v54 }
  0xf9   : > { %487 = vst.msk [vmem:[%s844_s8 + $0x8] sm:$0xff] %vm485_vm1, %v412_v59  ;;  %495 = vst.msk [vmem:[%s844_s8 + $0x48] sm:$0xff] %vm485_vm1, %v452_v60 }
  0xfa   : > { %486 = vst.msk [vmem:[%s844_s8] sm:$0xff] %vm485_vm1, %v407_v63  ;;  %494 = vst.msk [vmem:[%s844_s8 + $0x40] sm:$0xff] %vm485_vm1, %v447_v0  ;;  %v631_v3 = vpop.f32.mrb[2].mxu0  ;;  %v643_v4 = vpop.f32.mrb[2].mxu1 }
  0xfb   : > { %v422_v5 = vadd.f32 %v631_v3, %v229_v47  ;;  %v462_v6 = vadd.f32 %v643_v4, %v269_v55  ;;  %v416_v7 = vpop.f32.mrb[3].mxu0  ;;  %v456_v8 = vpop.f32.mrb[3].mxu1 }
  0xfc   : > { %v417_v9 = vadd.f32 %v416_v7, %v224_v45  ;;  %v457_v10 = vadd.f32 %v456_v8, %v264_v56 }
  0xfd   : > { %489 = vst.msk [vmem:[%s844_s8 + $0x18] sm:$0xff] %vm485_vm1, %v422_v5  ;;  %497 = vst.msk [vmem:[%s844_s8 + $0x58] sm:$0xff] %vm485_vm1, %v462_v6 }
  0xfe   : > { %488 = vst.msk [vmem:[%s844_s8 + $0x10] sm:$0xff] %vm485_vm1, %v417_v9  ;;  %496 = vst.msk [vmem:[%s844_s8 + $0x50] sm:$0xff] %vm485_vm1, %v457_v10  ;;  %v634_v11 = vpop.f32.mrb[4].mxu0  ;;  %v646_v12 = vpop.f32.mrb[4].mxu1 }
  0xff   : > { %v432_v13 = vadd.f32 %v634_v11, %v239_v49  ;;  %v472_v14 = vadd.f32 %v646_v12, %v279_v1  ;;  %v426_v15 = vpop.f32.mrb[5].mxu0  ;;  %v466_v16 = vpop.f32.mrb[5].mxu1 }
 0x100   : > { %v427_v17 = vadd.f32 %v426_v15, %v234_v50  ;;  %v467_v18 = vadd.f32 %v466_v16, %v274_v2 }
 0x101   : > { %491 = vst.msk [vmem:[%s844_s8 + $0x28] sm:$0xff] %vm485_vm1, %v432_v13  ;;  %499 = vst.msk [vmem:[%s844_s8 + $0x68] sm:$0xff] %vm485_vm1, %v472_v14 }
 0x102   : > { %490 = vst.msk [vmem:[%s844_s8 + $0x20] sm:$0xff] %vm485_vm1, %v427_v17  ;;  %498 = vst.msk [vmem:[%s844_s8 + $0x60] sm:$0xff] %vm485_vm1, %v467_v18  ;;  %v637_v21 = vpop.f32.mrb[6].mxu0  ;;  %v649_v22 = vpop.f32.mrb[6].mxu1 }
 0x103   : > { %v442_v23 = vadd.f32 %v637_v21, %v249_v51  ;;  %v482_v24 = vadd.f32 %v649_v22, %v289_v19  ;;  %v436_v25 = vpop.f32.mrb[7].mxu0  ;;  %v476_v26 = vpop.f32.mrb[7].mxu1 }
 0x104   : > { %v437_v27 = vadd.f32 %v436_v25, %v244_v52  ;;  %v477_v28 = vadd.f32 %v476_v26, %v284_v20 }
 0x105   : > { %493 = vst.msk [vmem:[%s844_s8 + $0x38] sm:$0xff] %vm485_vm1, %v442_v23  ;;  %501 = vst.msk [vmem:[%s844_s8 + $0x78] sm:$0xff] %vm485_vm1, %v482_v24 }
 0x106   : > { %492 = vst.msk [vmem:[%s844_s8 + $0x30] sm:$0xff] %vm485_vm1, %v437_v27  ;;  %500 = vst.msk [vmem:[%s844_s8 + $0x70] sm:$0xff] %vm485_vm1, %v477_v28 }
 0x107 PF: > { %s13_s12 = sadd.s32 1, %s691_s12  }
 0x108   : > { %p10_p4 = scmp.ge.s32.totalorder %s13_s12, 4  }
 0x10a   :  { %12 = sbr.rel (!%p10_p4) target bundleno = 1 (0x1), region = 62 }

</bundles_post_ra>
